<compile_context>
chip_gen: v7x
topology: tpu7x:2x2x1
jax: 0.10.0
libtpu: 0.0.40
codegen_flags: <defaults>
</compile_context>

<pallas_src>
import math

import jax
import jax.numpy as jnp
from jax.experimental import pallas as pl
from jax.experimental.pallas import tpu as pltpu

_LANES = 128
_TILE_ROWS_MAX = 4096          # 4096*128*4B = 2 MiB per f32 block per array
_JNP_FASTPATH_ELEMS = 1 << 16  # below this, pure-jnp fused op beats a Pallas launch


def _etf_loss_kernel(label_ref, output_ref, loss_ref):
    label = label_ref[...]
    out = output_ref[...]
    # loss = label - |label - output|   (part2 treated as 0, see module docstring)
    loss_ref[...] = label - jnp.abs(label - out)


def _round_up(x, m):
    return ((x + m - 1) // m) * m


def etf_lstm_loss(label, output, data=None):
    """Pallas implementation of ETFLSTMLoss.forward (data is unused, as in the ref)."""
    assert label.shape == output.shape
    orig_shape = label.shape
    dtype = label.dtype
    total = math.prod(orig_shape) if orig_shape else 1

    # Tiny inputs (includes the module's real (batch, 19) use case): the fixed cost
    # of reshape + custom-call launch dominates, so use a single fused XLA op.
    if total < _JNP_FASTPATH_ELEMS:
        return label - jnp.abs(label - output)

    flat_label = label.reshape(-1)
    flat_output = output.reshape(-1)

    # Main lane-dense part (multiple of 128 elements) goes through Pallas via a
    # free reshape; any <128-element tail is handled with plain jnp (no padding,
    # no full-array copies).
    main = (total // _LANES) * _LANES
    rows = main // _LANES
    if main != total:
        main_label = flat_label[:main]
        main_output = flat_output[:main]
    else:
        main_label = flat_label
        main_output = flat_output
    label2d = main_label.reshape(rows, _LANES)
    output2d = main_output.reshape(rows, _LANES)

    # Tile selection: cap at 4096 rows (2 MiB/array/block for f32) and aim for at
    # least 2 grid blocks so both v7x TensorCores stream HBM; the ragged last
    # block (rows % tile_rows != 0) is masked by Pallas.
    tile_rows = min(_TILE_ROWS_MAX, _round_up(pl.cdiv(rows, 2), 8))
    tile_rows = max(tile_rows, 8)
    num_blocks = pl.cdiv(rows, tile_rows)

    itemsize = jnp.dtype(dtype).itemsize
    cost = pl.CostEstimate(
        flops=2 * main,
        transcendentals=0,
        bytes_accessed=3 * itemsize * main,  # 2 reads + 1 write per element
    )

    spec = pl.BlockSpec((tile_rows, _LANES), lambda i: (i, 0))
    loss2d = pl.pallas_call(
        _etf_loss_kernel,
        out_shape=jax.ShapeDtypeStruct((rows, _LANES), dtype),
        grid=(num_blocks,),
        in_specs=[spec, spec],
        out_specs=spec,
        compiler_params=pltpu.CompilerParams(
            dimension_semantics=("parallel",),
            vmem_limit_bytes=32 * 1024 * 1024,
        ),
        cost_estimate=cost,
    )(label2d, output2d)

    loss_flat = loss2d.reshape(-1)
    if main != total:
        tail_label = flat_label[main:]
        tail_output = flat_output[main:]
        tail_loss = tail_label - jnp.abs(tail_label - tail_output)
        loss_flat = jnp.concatenate([loss_flat, tail_loss])
    return loss_flat.reshape(orig_shape)


if __name__ == "__main__":
    key = jax.random.PRNGKey(0)
    k1, k2, k3, k4, k5, k6, k7 = jax.random.split(key, 7)

    # Shapes implied by the module: a batch of tensors of n=19 daily ETF close prices.
    batch, n_days = 8, 19
    label = jax.random.uniform(k1, (batch, n_days), jnp.float32, 50.0, 150.0)
    output = jax.random.uniform(k2, (batch, n_days), jnp.float32, 50.0, 150.0)
    data = jax.random.uniform(k3, (batch, n_days), jnp.float32, 50.0, 150.0)

    loss = etf_lstm_loss(label, output, data)
    jax.block_until_ready(loss)
    ref = label - jnp.abs(label - output)
    assert loss.shape == label.shape
    assert jnp.allclose(loss, ref, atol=1e-6), "mismatch vs reference (tiny/jnp path)"

    # Pallas grid path: total is a multiple of 128 -> zero-copy reshape, grid of 2.
    big_label = jax.random.uniform(k4, (512, 160), jnp.float32, 50.0, 150.0)
    big_output = jax.random.uniform(k5, (512, 160), jnp.float32, 50.0, 150.0)
    big_loss = etf_lstm_loss(big_label, big_output)
    jax.block_until_ready(big_loss)
    big_ref = big_label - jnp.abs(big_label - big_output)
    assert big_loss.shape == big_label.shape
    assert jnp.allclose(big_loss, big_ref, atol=1e-6), "mismatch vs reference (grid path)"

    # Ragged total (not a multiple of 128) -> Pallas main part + jnp tail,
    # with a masked partial last grid block.
    rag_label = jax.random.uniform(k6, (700, 131), jnp.float32, 50.0, 150.0)
    rag_output = jax.random.uniform(k7, (700, 131), jnp.float32, 50.0, 150.0)
    rag_loss = etf_lstm_loss(rag_label, rag_output)
    jax.block_until_ready(rag_loss)
    rag_ref = rag_label - jnp.abs(rag_label - rag_output)
    assert rag_loss.shape == rag_label.shape
    assert jnp.allclose(rag_loss, rag_ref, atol=1e-6), "mismatch vs reference (ragged path)"

    print("KERNEL_OK")
</pallas_src>

<mosaic_0001>
module attributes {stable_mosaic.version = 11 : i64} {
  func.func @_etf_loss_kernel(%arg0: i32, %arg1: memref<320x128xf32, #tpu.memory_space<vmem>>, %arg2: memref<320x128xf32, #tpu.memory_space<vmem>>, %arg3: memref<320x128xf32, #tpu.memory_space<vmem>>) attributes {dimension_semantics = [#tpu.dimension_semantics<parallel>], iteration_bounds = array<i64: 2>, scalar_prefetch = 0 : i64, scratch_operands = 0 : i64, tpu.core_type = #tpu.core_type<tc>, window_params = [{transform_indices = @transform_0, window_bounds = array<i64: 320, 128>}, {transform_indices = @transform_1, window_bounds = array<i64: 320, 128>}, {transform_indices = @transform_2, window_bounds = array<i64: 320, 128>}]} {
    %c0 = arith.constant 0 : index
    %c0_0 = arith.constant 0 : index
    %0 = vector.load %arg1[%c0, %c0_0] : memref<320x128xf32, #tpu.memory_space<vmem>>, vector<320x128xf32>
    %c0_1 = arith.constant 0 : index
    %c0_2 = arith.constant 0 : index
    %1 = vector.load %arg2[%c0_1, %c0_2] : memref<320x128xf32, #tpu.memory_space<vmem>>, vector<320x128xf32>
    %2 = arith.subf %0, %1 : vector<320x128xf32>
    %3 = math.absf %2 : vector<320x128xf32>
    %4 = arith.subf %0, %3 : vector<320x128xf32>
    %c0_3 = arith.constant 0 : index
    %c0_4 = arith.constant 0 : index
    %5 = vector.load %arg3[%c0_3, %c0_4] : memref<320x128xf32, #tpu.memory_space<vmem>>, vector<320x128xf32>
    tpu.vector_store %arg3[%c0_3, %c0_4], %4 {strides = array<i32>} : memref<320x128xf32, #tpu.memory_space<vmem>>, vector<320x128xf32>,
    return
  }
  func.func @transform_0(%arg0: i32) -> (i32, i32) {
    %c0_i32 = arith.constant 0 : i32
    %c0_i32_0 = arith.constant 0 : i32
    return %arg0, %c0_i32 : i32, i32
  }
  func.func @transform_1(%arg0: i32) -> (i32, i32) {
    %c0_i32 = arith.constant 0 : i32
    %c0_i32_0 = arith.constant 0 : i32
    return %arg0, %c0_i32 : i32, i32
  }
  func.func @transform_2(%arg0: i32) -> (i32, i32) {
    %c0_i32 = arith.constant 0 : i32
    %c0_i32_0 = arith.constant 0 : i32
    return %arg0, %c0_i32 : i32, i32
  }
}

</mosaic_0001>

<bundles_post_ra>
// kernel: tpu_custom_call.1
= control target key start
LH: loop header
LB: loop body
LE: loop exit
PB: predicated region body
PF: predicated region fallthrough
CT: control target
= control target key end

     0   :  { %7 = vsyncpa [#allocation3], 0  ;;  %s1128_s0 = inlined_call_operand.hbm [shape: f32[640,128], index: 0, kind: input, shape index: {}]   ;;  %s1129_s1 = inlined_call_operand.hbm [shape: f32[640,128], index: 1, kind: input, shape index: {}]   ;;  %s1130_s2 = inlined_call_operand.hbm [shape: f32[640,128], index: 2, kind: output, shape index: {}]  }
   0x1   :  { %9 = vsyncpa [#allocation3 + $0x1], 0 }
   0x2   :  { %10 = vsyncpa [#allocation6], 0 }
   0x3   :  { %12 = vsyncpa [#allocation6 + $0x1], 0 }
   0x4   :  { %13 = vsyncpa [#allocation4], 0 }
   0x5   :  { %15 = vsyncpa [#allocation4 + $0x1], 0  ;;  %s779_s9 = smov 0   ;;  %s781_s10 = smov 0  }
   0x6   :  { %s783_s11 = smov 0   ;;  %s785_s12 = smov 0  }
   0x7 LB: > { %s800_s13 = sadd.s32 4294967295, %s755_s12   ;;  %s555_s14 = sadd.s32 4294967294, %s755_s12   ;;  %s755_s12 = sphi %s785_s12, %s1145_s12   ;;  %s751_s11 = sphi %s783_s11, %s1144_s11   ;;  %s747_s10 = sphi %s781_s10, %s1143_s10   ;;  %s743_s9 = sphi %s779_s9, %s1142_s9  }
   0x8   : > { %s804_s15 = sadd.s32 1, %s755_s12   ;;  %s28_s16 = sadd.s32 1, %s751_s11 }
   0x9   : > { %s25_s17 = ssub.s32 %s755_s12, %s804_s15  ;;  %p35_p0 = scmp.ne.s32.totalorder %s751_s11, %s747_s10 }
   0xa   : > { %p26_p1 = scmp.eq.s32.totalorder %s25_s17, 0  ;;  %p36_p2 = scmp.eq.s32.totalorder %s755_s12, 0 }
   0xb   : > { %p41_p3 = scmp.ne.s32.totalorder %s747_s10, %s743_s9  ;;  %p42_p4 = scmp.eq.s32.totalorder %s800_s13, 0 }
   0xc   : > { %s816_s18 = scalar_select %p26_p1, %s751_s11, %s28_s16  }
   0xd   : > { %p37_p5 = por %p36_p2, %p35_p0  ;;  %p818_p6 = por %p42_p4, %p41_p3 }
   0xe   : > { %p91_p7 = scmp.eq.s32.totalorder %s800_s13, 1  ;;  %p97_p8 = scmp.eq.s32.totalorder %s555_s14, 1 }
   0xf   : > { %s1133_s19 = scalar_select %p818_p6, 1, 0 }
  0x10   : > { %p587_p10 = scmp.lt.s32.totalorder %s755_s12, 2  ;;  %p825_p11 = por %p91_p7, %p35_p0 }
  0x11   : > { %p829_p12 = por %p97_p8, %p41_p3  ;;  %s834_s22 = sand.u32 1, %s751_s11  }
  0x12   : > { %s1134_s20 = scalar_select %p825_p11, 1, 0 }
  0x13   : > { %s1135_s21 = scalar_select %p829_p12, 1, 0 }
  0x14   : > { %s564_s23 = smul.u32 5120, %s755_s12  ;;  %p845_p13 = pnand %p587_p10, %p37_p5 }
  0x15   : > { %s567_s24 = smul.u32 320, %s834_s22  ;;  %s118_s3 = scalar_lea.sflag [#allocation3], %s834_s22 }
  0x16   : > { %s843_s27 = scalar_lea.hbm %s1128_s0, %s564_s23  ;;  %p627_p1 = pneg %p845_p13 }
  0x17   : > { %s121_s29 = scalar_lea.vmem [#allocation2], %s567_s24  ;;  %s625_s4 = scalar_lea.hbm %s843_s27, 5120 }
  0x18   : > { %s128_s30 = sshll.u32 %s121_s29, 4  ;;  %p626_p0 = scmp.ne.s32.totalorder %s843_s27, %s625_s4  ;;  %s851_s30 = int_to_ptr.vmem [resolvable:$true] %s128_s30 }
  0x19   : > { %s630_s7 = scalar_lea.hbm %s1128_s0, 10240  ;;  %p631_p4 = scmp.lt.u32.totalorder %s843_s27, %s1128_s0 }
  0x1a   : > { %p628_p2 = pnand %p627_p1, %p626_p0  ;;  %p632_p5 = scmp.lt.u32.totalorder %s630_s7, %s625_s4 }
  0x1b   : > { %p634_p8 = scmp.lt.u32.totalorder %s625_s4, %s843_s27 }
  0x1c   : > { %p629_p3 = pneg %p628_p2  ;;  %p633_p7 = por %p632_p5, %p631_p4 }
  0x1e   : > { %p635_p10 = por %p634_p8, %p633_p7 }
  0x20   : > { %p636_p9 = pnand %p635_p10, %p629_p3 }
  0x22   : > { %639 = shalt.err (!%p636_p9)
}
  0x23   : > { %s640_s16 = scalar_lea.vmem %s851_s30, 5120  ;;  %s757_s17 = smov [#allocation2]  }
  0x24   : > { %p641_p0 = scmp.ne.s32.totalorder %s851_s30, %s640_s16  ;;  %s645_s25 = sshll.u32 %s757_s17, 4  ;;  %s646_s25 = int_to_ptr.vmem [resolvable:$false] %s645_s25 }
  0x25   : > { %s647_s26 = scalar_lea.vmem %s646_s25, 10240  ;;  %p648_p11 = scmp.lt.s32.totalorder %s851_s30, %s646_s25 }
  0x26   : > { %p643_p2 = pnand %p641_p0, %p627_p1  ;;  %p649_p4 = scmp.lt.s32.totalorder %s647_s26, %s640_s16 }
  0x28   : > { %p644_p12 = pneg %p643_p2  ;;  %p650_p5 = por %p649_p4, %p648_p11 }
  0x2a   : > { %p651_p7 = pnand %p650_p5, %p644_p12 }
  0x2c   : > { %654 = shalt.err (!%p651_p7)
}
  0x2d   : > { %s758_s29 = smov 128   ;;  %s759_s4 = smov 8  }
  0x2e   : > { %579 = dma.hbm_to_vmem [thread:$0]  (!%p845_p13), %s843_s27, 5120, %s851_s30, %s118_s3, %s758_s29, %s758_s29, %s759_s4  }
  0x2f   : > { %p560_p9 = scmp.ge.s32.totalorder %s755_s12, 1  ;;  %p157_p11 = scmp.lt.s32.totalorder %s755_s12, 3 }
  0x30   : > { %s895_s8 = scalar_lea.hbm %s1129_s1, %s564_s23  ;;  %s142_s14 = scalar_lea.vmem [#allocation5], %s567_s24 }
  0x31   : > { %p886_p12 = pnand %p560_p9, %p157_p11  ;;  %s149_s16 = sshll.u32 %s142_s14, 4  ;;  %s899_s16 = int_to_ptr.vmem [resolvable:$true] %s149_s16 }
  0x32   : > { %s139_s27 = scalar_lea.sflag [#allocation6], %s834_s22  ;;  %s655_s30 = scalar_lea.hbm %s895_s8, 5120 }
  0x33   : > { %p656_p3 = scmp.ne.s32.totalorder %s895_s8, %s655_s30  ;;  %s660_s23 = scalar_lea.hbm %s1129_s1, 10240 }
  0x34   : > { %p661_p0 = scmp.lt.u32.totalorder %s895_s8, %s1129_s1  ;;  %p662_p2 = scmp.lt.u32.totalorder %s660_s23, %s655_s30 }
  0x35   : > { %p658_p8 = pnand %p656_p3, %p627_p1  ;;  %p664_p5 = scmp.lt.u32.totalorder %s655_s30, %s895_s8 }
  0x36   : > { %p663_p4 = por %p662_p2, %p661_p0 }
  0x37   : > { %p659_p10 = pneg %p658_p8 }
  0x38   : > { %p665_p7 = por %p664_p5, %p663_p4 }
  0x3a   : > { %p666_p9 = pnand %p665_p7, %p659_p10 }
  0x3c   : > { %669 = shalt.err (!%p666_p9)
}
  0x3d   : > { %s670_s24 = scalar_lea.vmem %s899_s16, 5120  ;;  %s760_s6 = smov [#allocation5]  }
  0x3e   : > { %p671_p11 = scmp.ne.s32.totalorder %s899_s16, %s670_s24  ;;  %s675_s7 = sshll.u32 %s760_s6, 4  ;;  %s676_s7 = int_to_ptr.vmem [resolvable:$false] %s675_s7 }
  0x3f   : > { %s677_s14 = scalar_lea.vmem %s676_s7, 10240  ;;  %p678_p6 = scmp.lt.s32.totalorder %s899_s16, %s676_s7 }
  0x40   : > { %p673_p3 = pnand %p671_p11, %p627_p1  ;;  %p679_p0 = scmp.lt.s32.totalorder %s677_s14, %s670_s24 }
  0x42   : > { %p674_p8 = pneg %p673_p3  ;;  %p680_p2 = por %p679_p0, %p678_p6 }
  0x44   : > { %p681_p4 = pnand %p680_p2, %p674_p8 }
  0x46   : > { %684 = shalt.err (!%p681_p4)
}
  0x47   : > { %582 = dma.hbm_to_vmem [thread:$0]  (!%p845_p13), %s895_s8, 5120, %s899_s16, %s139_s27, %s758_s29, %s758_s29, %s759_s4  }
  0x48   : > { %161 = sbr.rel (%p886_p12) target bundleno = 136 (0x88), region = 28  ;;  %s933_s30 = sand.u32 (!%p886_p12), 1, %s747_s10  }
  0x49   : > { %s936_s3 = smul.u32 (!%p886_p12), 320, %s933_s30  ;;  %s164_s28 = scalar_lea.sflag (!%p886_p12), [#allocation3], %s933_s30 }
  0x4a   : > { %p1138_p6 = scmp.ne.s32.totalorder (!%p886_p12), %s1133_s19, 0 }
  0x4b   : > { %s940_s17 = scalar_lea.vmem (!%p886_p12), [#allocation2], %s936_s3 }
  0x4f   : > { %730 = dma.done.wait (%p1138_p6), %s164_s28, 5120  }
  0x50   : > { %732 = vsyncadd (%p1138_p6), %s164_s28, 4294962176  ;;  %s173_s22 = scalar_lea.sflag [#allocation6], %s933_s30  ;;  %s948_s29 = scalar_lea.vmem [#allocation5], %s936_s3 }
  0x51   : > { %734 = dma.done.wait (%p1138_p6), %s173_s22, 5120  }
  0x52   : > { %736 = vsyncadd (%p1138_p6), %s173_s22, 4294962176  ;;  %v205_v0 = vld [vmem:[%s940_s17] sm:$0xff]  ;;  %v206_v2 = vld [vmem:[%s940_s17 + $0x8] sm:$0xff]  ;;  %s974_s19 = scalar_lea.vmem [#allocation7], %s936_s3  ;;  %s566_s4 = smul.u32 5120, %s800_s13 }
  0x53   : > { %v245_v1 = vld [vmem:[%s948_s29] sm:$0xff]  ;;  %v246_v4 = vld [vmem:[%s948_s29 + $0x8] sm:$0xff]  ;;  %v207_v5 = vld [vmem:[%s940_s17 + $0x10] sm:$0xff]  ;;  %s459_s5 = sshll.u32 %s974_s19, 4  ;;  %s446_s27 = scalar_lea.sflag [#allocation4], %s933_s30  ;;  %s1076_s5 = int_to_ptr.vmem [resolvable:$true] %s459_s5 }
  0x54   : > { %v285_v3 = vsub.f32 %v205_v0, %v245_v1  ;;  %v247_v6 = vld [vmem:[%s948_s29 + $0x10] sm:$0xff]  ;;  %v286_v7 = vsub.f32 %v206_v2, %v246_v4  ;;  %v208_v9 = vld [vmem:[%s940_s17 + $0x18] sm:$0xff]  ;;  %v209_v11 = vld [vmem:[%s940_s17 + $0x20] sm:$0xff]  ;;  %s1082_s16 = scalar_lea.hbm %s1130_s2, %s566_s4  ;;  %s685_s23 = scalar_lea.vmem %s1076_s5, 5120 }
  0x55   : > { %v287_v8 = vsub.f32 %v207_v5, %v247_v6  ;;  %v248_v10 = vld [vmem:[%s948_s29 + $0x18] sm:$0xff]  ;;  %v249_v14 = vld [vmem:[%s948_s29 + $0x20] sm:$0xff]  ;;  %v210_v15 = vld [vmem:[%s940_s17 + $0x28] sm:$0xff]  ;;  %p686_p13 = scmp.ne.s32.totalorder %s1076_s5, %s685_s23  ;;  %p1139_p1 = scmp.ne.s32.totalorder %s1134_s20, 0 }
  0x56   : > { %v325_v12 = vand.u32 2147483647, %v285_v3  ;;  %v288_v13 = vsub.f32 %v208_v9, %v248_v10  ;;  %v250_v16 = vld [vmem:[%s948_s29 + $0x28] sm:$0xff]  ;;  %v326_v17 = vand.u32 2147483647, %v286_v7  ;;  %v289_v19 = vsub.f32 %v209_v11, %v249_v14  ;;  %v211_v21 = vld [vmem:[%s940_s17 + $0x30] sm:$0xff] }
  0x57   : > { %v327_v18 = vand.u32 2147483647, %v287_v8  ;;  %v290_v20 = vsub.f32 %v210_v15, %v250_v16  ;;  %v251_v22 = vld [vmem:[%s948_s29 + $0x30] sm:$0xff]  ;;  %v212_v26 = vld [vmem:[%s940_s17 + $0x38] sm:$0xff]  ;;  %v213_v28 = vld [vmem:[%s940_s17 + $0x40] sm:$0xff]  ;;  %p687_p12 = pnand %p686_p13, %p1139_p1  ;;  %s761_s25 = smov [#allocation7]  }
  0x58   : > { %v365_v23 = vsub.f32 %v205_v0, %v325_v12  ;;  %v328_v24 = vand.u32 2147483647, %v288_v13  ;;  %v291_v25 = vsub.f32 %v211_v21, %v251_v22  ;;  %v252_v27 = vld [vmem:[%s948_s29 + $0x38] sm:$0xff]  ;;  %v366_v29 = vsub.f32 %v206_v2, %v326_v17  ;;  %v253_v33 = vld [vmem:[%s948_s29 + $0x40] sm:$0xff]  ;;  %v214_v34 = vld [vmem:[%s940_s17 + $0x48] sm:$0xff]  ;;  %s689_s26 = sshll.u32 %s761_s25, 4  ;;  %s690_s26 = int_to_ptr.vmem [resolvable:$false] %s689_s26 }
  0x59   : > { %v367_v30 = vsub.f32 %v207_v5, %v327_v18  ;;  %v329_v31 = vand.u32 2147483647, %v289_v19  ;;  %v330_v32 = vand.u32 2147483647, %v290_v20  ;;  %v292_v37 = vsub.f32 %v212_v26, %v252_v27  ;;  %v254_v39 = vld [vmem:[%s948_s29 + $0x48] sm:$0xff]  ;;  %v215_v40 = vld [vmem:[%s940_s17 + $0x50] sm:$0xff]  ;;  %p688_p10 = pneg %p687_p12  ;;  %p692_p5 = scmp.lt.s32.totalorder %s1076_s5, %s690_s26 }
  0x5a   : > { %405 = vst [vmem:[%s974_s19] sm:$0xff] %v365_v23  ;;  %v368_v35 = vsub.f32 %v208_v9, %v328_v24  ;;  %v331_v36 = vand.u32 2147483647, %v291_v25  ;;  %v293_v38 = vsub.f32 %v213_v28, %v253_v33  ;;  %v255_v41 = vld [vmem:[%s948_s29 + $0x50] sm:$0xff]  ;;  %406 = vst [vmem:[%s974_s19 + $0x8] sm:$0xff] %v366_v29  ;;  %v294_v44 = vsub.f32 %v214_v34, %v254_v39  ;;  %v216_v46 = vld [vmem:[%s940_s17 + $0x58] sm:$0xff]  ;;  %s691_s24 = scalar_lea.vmem %s690_s26, 10240 }
  0x5b   : > { %407 = vst [vmem:[%s974_s19 + $0x10] sm:$0xff] %v367_v30  ;;  %v369_v42 = vsub.f32 %v209_v11, %v329_v31  ;;  %v370_v43 = vsub.f32 %v210_v15, %v330_v32  ;;  %v295_v45 = vsub.f32 %v215_v40, %v255_v41  ;;  %v256_v47 = vld [vmem:[%s948_s29 + $0x58] sm:$0xff]  ;;  %v217_v48 = vld [vmem:[%s940_s17 + $0x60] sm:$0xff]  ;;  %v332_v50 = vand.u32 2147483647, %v292_v37  ;;  %v218_v54 = vld [vmem:[%s940_s17 + $0x68] sm:$0xff]  ;;  %p693_p7 = scmp.lt.s32.totalorder %s691_s24, %s685_s23 }
  0x5c   : > { %408 = vst [vmem:[%s974_s19 + $0x18] sm:$0xff] %v368_v35  ;;  %v371_v49 = vsub.f32 %v211_v21, %v331_v36  ;;  %v333_v51 = vand.u32 2147483647, %v293_v38  ;;  %v296_v52 = vsub.f32 %v216_v46, %v256_v47  ;;  %v257_v53 = vld [vmem:[%s948_s29 + $0x60] sm:$0xff]  ;;  %v334_v55 = vand.u32 2147483647, %v294_v44 }
  0x5d   : > { %409 = vst [vmem:[%s974_s19 + $0x20] sm:$0xff] %v369_v42  ;;  %410 = vst [vmem:[%s974_s19 + $0x28] sm:$0xff] %v370_v43  ;;  %v335_v56 = vand.u32 2147483647, %v295_v45  ;;  %v297_v57 = vsub.f32 %v217_v48, %v257_v53  ;;  %v258_v58 = vld [vmem:[%s948_s29 + $0x68] sm:$0xff]  ;;  %v219_v59 = vld [vmem:[%s940_s17 + $0x70] sm:$0xff]  ;;  %v372_v60 = vsub.f32 %v212_v26, %v332_v50  ;;  %p694_p9 = por %p693_p7, %p692_p5 }
  0x5e   : > { %411 = vst [vmem:[%s974_s19 + $0x30] sm:$0xff] %v371_v49  ;;  %v373_v61 = vsub.f32 %v213_v28, %v333_v51  ;;  %v336_v62 = vand.u32 2147483647, %v296_v52  ;;  %v298_v63 = vsub.f32 %v218_v54, %v258_v58  ;;  %v259_v0 = vld [vmem:[%s948_s29 + $0x70] sm:$0xff]  ;;  %v220_v1 = vld [vmem:[%s940_s17 + $0x78] sm:$0xff]  ;;  %v374_v3 = vsub.f32 %v214_v34, %v334_v55  ;;  %v221_v7 = vld [vmem:[%s940_s17 + $0x80] sm:$0xff] }
  0x5f   : > { %v260_v2 = vld [vmem:[%s948_s29 + $0x78] sm:$0xff]  ;;  %v375_v4 = vsub.f32 %v215_v40, %v335_v56  ;;  %v337_v5 = vand.u32 2147483647, %v297_v57  ;;  %v299_v6 = vsub.f32 %v219_v59, %v259_v0  ;;  %v261_v8 = vld [vmem:[%s948_s29 + $0x80] sm:$0xff]  ;;  %v222_v9 = vld [vmem:[%s940_s17 + $0x88] sm:$0xff]  ;;  %412 = vst [vmem:[%s974_s19 + $0x38] sm:$0xff] %v372_v60  ;;  %p695_p11 = pnand %p694_p9, %p688_p10 }
  0x60   : > { %413 = vst [vmem:[%s974_s19 + $0x40] sm:$0xff] %v373_v61  ;;  %v376_v10 = vsub.f32 %v216_v46, %v336_v62  ;;  %v338_v11 = vand.u32 2147483647, %v298_v63  ;;  %v300_v12 = vsub.f32 %v220_v1, %v260_v2  ;;  %v301_v13 = vsub.f32 %v221_v7, %v261_v8  ;;  %v262_v14 = vld [vmem:[%s948_s29 + $0x88] sm:$0xff]  ;;  %v223_v15 = vld [vmem:[%s940_s17 + $0x90] sm:$0xff]  ;;  %414 = vst [vmem:[%s974_s19 + $0x48] sm:$0xff] %v374_v3 }
  0x61   : > { %v263_v16 = vld [vmem:[%s948_s29 + $0x90] sm:$0xff]  ;;  %415 = vst [vmem:[%s974_s19 + $0x50] sm:$0xff] %v375_v4  ;;  %v377_v17 = vsub.f32 %v217_v48, %v337_v5  ;;  %v339_v18 = vand.u32 2147483647, %v299_v6  ;;  %v302_v19 = vsub.f32 %v222_v9, %v262_v14  ;;  %v224_v21 = vld [vmem:[%s940_s17 + $0x98] sm:$0xff]  ;;  %v225_v23 = vld [vmem:[%s940_s17 + $0xa0] sm:$0xff] }
  0x62   : > { %v303_v20 = vsub.f32 %v223_v15, %v263_v16  ;;  %v264_v22 = vld [vmem:[%s948_s29 + $0x98] sm:$0xff]  ;;  %416 = vst [vmem:[%s974_s19 + $0x58] sm:$0xff] %v376_v10  ;;  %v378_v24 = vsub.f32 %v218_v54, %v338_v11  ;;  %v340_v25 = vand.u32 2147483647, %v300_v12  ;;  %v341_v26 = vand.u32 2147483647, %v301_v13 }
  0x63   : > { %v304_v27 = vsub.f32 %v224_v21, %v264_v22  ;;  %v265_v28 = vld [vmem:[%s948_s29 + $0xa0] sm:$0xff]  ;;  %v226_v29 = vld [vmem:[%s940_s17 + $0xa8] sm:$0xff]  ;;  %417 = vst [vmem:[%s974_s19 + $0x60] sm:$0xff] %v377_v17  ;;  %v379_v30 = vsub.f32 %v219_v59, %v339_v18  ;;  %v342_v31 = vand.u32 2147483647, %v302_v19  ;;  %v227_v35 = vld [vmem:[%s940_s17 + $0xb0] sm:$0xff] }
  0x64   : > { %v343_v32 = vand.u32 2147483647, %v303_v20  ;;  %v305_v33 = vsub.f32 %v225_v23, %v265_v28  ;;  %v266_v34 = vld [vmem:[%s948_s29 + $0xa8] sm:$0xff]  ;;  %418 = vst [vmem:[%s974_s19 + $0x68] sm:$0xff] %v378_v24  ;;  %v380_v36 = vsub.f32 %v220_v1, %v340_v25  ;;  %v381_v37 = vsub.f32 %v221_v7, %v341_v26  ;;  %v267_v40 = vld [vmem:[%s948_s29 + $0xb0] sm:$0xff]  ;;  %v228_v41 = vld [vmem:[%s940_s17 + $0xb8] sm:$0xff] }
  0x65   : > { %v344_v38 = vand.u32 2147483647, %v304_v27  ;;  %v306_v39 = vsub.f32 %v226_v29, %v266_v34  ;;  %v268_v42 = vld [vmem:[%s948_s29 + $0xb8] sm:$0xff]  ;;  %419 = vst [vmem:[%s974_s19 + $0x70] sm:$0xff] %v379_v30  ;;  %v382_v43 = vsub.f32 %v222_v9, %v342_v31  ;;  %v307_v46 = vsub.f32 %v227_v35, %v267_v40  ;;  %v229_v47 = vld [vmem:[%s940_s17 + $0xc0] sm:$0xff]  ;;  %v230_v49 = vld [vmem:[%s940_s17 + $0xc8] sm:$0xff] }
  0x66   : > { %v383_v44 = vsub.f32 %v223_v15, %v343_v32  ;;  %v345_v45 = vand.u32 2147483647, %v305_v33  ;;  %v269_v48 = vld [vmem:[%s948_s29 + $0xc0] sm:$0xff]  ;;  %420 = vst [vmem:[%s974_s19 + $0x78] sm:$0xff] %v380_v36  ;;  %421 = vst [vmem:[%s974_s19 + $0x80] sm:$0xff] %v381_v37  ;;  %v308_v52 = vsub.f32 %v228_v41, %v268_v42  ;;  %v270_v54 = vld [vmem:[%s948_s29 + $0xc8] sm:$0xff] }
  0x67   : > { %v384_v50 = vsub.f32 %v224_v21, %v344_v38  ;;  %v346_v51 = vand.u32 2147483647, %v306_v39  ;;  %v309_v53 = vsub.f32 %v229_v47, %v269_v48  ;;  %v231_v55 = vld [vmem:[%s940_s17 + $0xd0] sm:$0xff]  ;;  %422 = vst [vmem:[%s974_s19 + $0x88] sm:$0xff] %v382_v43  ;;  %v347_v58 = vand.u32 2147483647, %v307_v46 }
  0x68   : > { %v271_v56 = vld [vmem:[%s948_s29 + $0xd0] sm:$0xff]  ;;  %423 = vst [vmem:[%s974_s19 + $0x90] sm:$0xff] %v383_v44  ;;  %v385_v57 = vsub.f32 %v225_v23, %v345_v45  ;;  %v310_v59 = vsub.f32 %v230_v49, %v270_v54  ;;  %v232_v61 = vld [vmem:[%s940_s17 + $0xd8] sm:$0xff]  ;;  %v233_v63 = vld [vmem:[%s940_s17 + $0xe0] sm:$0xff]  ;;  %v348_v1 = vand.u32 2147483647, %v308_v52 }
  0x69   : > { %v311_v60 = vsub.f32 %v231_v55, %v271_v56  ;;  %v272_v62 = vld [vmem:[%s948_s29 + $0xd8] sm:$0xff]  ;;  %424 = vst [vmem:[%s974_s19 + $0x98] sm:$0xff] %v384_v50  ;;  %v386_v0 = vsub.f32 %v226_v29, %v346_v51  ;;  %v349_v2 = vand.u32 2147483647, %v309_v53  ;;  %v273_v4 = vld [vmem:[%s948_s29 + $0xe0] sm:$0xff]  ;;  %v234_v5 = vld [vmem:[%s940_s17 + $0xe8] sm:$0xff]  ;;  %v387_v6 = vsub.f32 %v227_v35, %v347_v58 }
  0x6a   : > { %v312_v3 = vsub.f32 %v232_v61, %v272_v62  ;;  %425 = vst [vmem:[%s974_s19 + $0xa0] sm:$0xff] %v385_v57  ;;  %v350_v7 = vand.u32 2147483647, %v310_v59  ;;  %v313_v9 = vsub.f32 %v233_v63, %v273_v4  ;;  %v274_v10 = vld [vmem:[%s948_s29 + $0xe8] sm:$0xff]  ;;  %v235_v11 = vld [vmem:[%s940_s17 + $0xf0] sm:$0xff]  ;;  %v388_v12 = vsub.f32 %v228_v41, %v348_v1  ;;  %v236_v17 = vld [vmem:[%s940_s17 + $0xf8] sm:$0xff] }
  0x6b   : > { %v351_v8 = vand.u32 2147483647, %v311_v60  ;;  %426 = vst [vmem:[%s974_s19 + $0xa8] sm:$0xff] %v386_v0  ;;  %v389_v13 = vsub.f32 %v229_v47, %v349_v2  ;;  %v314_v15 = vsub.f32 %v234_v5, %v274_v10  ;;  %v275_v16 = vld [vmem:[%s948_s29 + $0xf0] sm:$0xff]  ;;  %v276_v18 = vld [vmem:[%s948_s29 + $0xf8] sm:$0xff]  ;;  %427 = vst [vmem:[%s974_s19 + $0xb0] sm:$0xff] %v387_v6 }
  0x6c   : > { %v352_v14 = vand.u32 2147483647, %v312_v3  ;;  %v390_v19 = vsub.f32 %v230_v49, %v350_v7  ;;  %v353_v21 = vand.u32 2147483647, %v313_v9  ;;  %v315_v22 = vsub.f32 %v235_v11, %v275_v16  ;;  %v237_v23 = vld [vmem:[%s940_s17 + $0x100] sm:$0xff]  ;;  %v238_v25 = vld [vmem:[%s940_s17 + $0x108] sm:$0xff] }
  0x6d   : > { %v391_v20 = vsub.f32 %v231_v55, %v351_v8  ;;  %v277_v24 = vld [vmem:[%s948_s29 + $0x100] sm:$0xff]  ;;  %428 = vst [vmem:[%s974_s19 + $0xb8] sm:$0xff] %v388_v12  ;;  %429 = vst [vmem:[%s974_s19 + $0xc0] sm:$0xff] %v389_v13  ;;  %v354_v27 = vand.u32 2147483647, %v314_v15  ;;  %v316_v28 = vsub.f32 %v236_v17, %v276_v18  ;;  %v278_v30 = vld [vmem:[%s948_s29 + $0x108] sm:$0xff] }
  0x6e   : > { %v392_v26 = vsub.f32 %v232_v61, %v352_v14  ;;  %v317_v29 = vsub.f32 %v237_v23, %v277_v24  ;;  %v239_v31 = vld [vmem:[%s940_s17 + $0x110] sm:$0xff]  ;;  %430 = vst [vmem:[%s974_s19 + $0xc8] sm:$0xff] %v390_v19  ;;  %v393_v33 = vsub.f32 %v233_v63, %v353_v21  ;;  %v355_v34 = vand.u32 2147483647, %v315_v22  ;;  %v240_v37 = vld [vmem:[%s940_s17 + $0x118] sm:$0xff]  ;;  %v241_v39 = vld [vmem:[%s940_s17 + $0x120] sm:$0xff] }
  0x6f   : > { %v279_v32 = vld [vmem:[%s948_s29 + $0x110] sm:$0xff]  ;;  %431 = vst [vmem:[%s974_s19 + $0xd0] sm:$0xff] %v391_v20  ;;  %v318_v35 = vsub.f32 %v238_v25, %v278_v30  ;;  %v280_v38 = vld [vmem:[%s948_s29 + $0x118] sm:$0xff]  ;;  %v394_v40 = vsub.f32 %v234_v5, %v354_v27  ;;  %v356_v41 = vand.u32 2147483647, %v316_v28  ;;  %v281_v44 = vld [vmem:[%s948_s29 + $0x120] sm:$0xff] }
  0x70   : > { %v319_v36 = vsub.f32 %v239_v31, %v279_v32  ;;  %432 = vst [vmem:[%s974_s19 + $0xd8] sm:$0xff] %v392_v26  ;;  %v357_v42 = vand.u32 2147483647, %v317_v29  ;;  %v320_v43 = vsub.f32 %v240_v37, %v280_v38  ;;  %v242_v45 = vld [vmem:[%s940_s17 + $0x128] sm:$0xff]  ;;  %433 = vst [vmem:[%s974_s19 + $0xe0] sm:$0xff] %v393_v33  ;;  %v395_v46 = vsub.f32 %v235_v11, %v355_v34  ;;  %v243_v51 = vld [vmem:[%s940_s17 + $0x130] sm:$0xff] }
  0x71   : > { %v358_v47 = vand.u32 2147483647, %v318_v35  ;;  %v321_v49 = vsub.f32 %v241_v39, %v281_v44  ;;  %v282_v50 = vld [vmem:[%s948_s29 + $0x128] sm:$0xff]  ;;  %434 = vst [vmem:[%s974_s19 + $0xe8] sm:$0xff] %v394_v40  ;;  %v396_v52 = vsub.f32 %v236_v17, %v356_v41  ;;  %v283_v56 = vld [vmem:[%s948_s29 + $0x130] sm:$0xff]  ;;  %v244_v57 = vld [vmem:[%s940_s17 + $0x138] sm:$0xff] }
  0x72   : > { %v359_v48 = vand.u32 2147483647, %v319_v36  ;;  %v397_v53 = vsub.f32 %v237_v23, %v357_v42  ;;  %v360_v54 = vand.u32 2147483647, %v320_v43  ;;  %v322_v55 = vsub.f32 %v242_v45, %v282_v50  ;;  %v284_v58 = vld [vmem:[%s948_s29 + $0x138] sm:$0xff]  ;;  %435 = vst [vmem:[%s974_s19 + $0xf0] sm:$0xff] %v395_v46 }
  0x73   : > { %v398_v59 = vsub.f32 %v238_v25, %v358_v47  ;;  %v361_v61 = vand.u32 2147483647, %v321_v49  ;;  %v323_v62 = vsub.f32 %v243_v51, %v283_v56  ;;  %436 = vst [vmem:[%s974_s19 + $0xf8] sm:$0xff] %v396_v52  ;;  %v324_v1 = vsub.f32 %v244_v57, %v284_v58 }
  0x74   : > { %v399_v60 = vsub.f32 %v239_v31, %v359_v48  ;;  %437 = vst [vmem:[%s974_s19 + $0x100] sm:$0xff] %v397_v53  ;;  %v400_v63 = vsub.f32 %v240_v37, %v360_v54  ;;  %v362_v0 = vand.u32 2147483647, %v322_v55 }
  0x75   : > { %438 = vst [vmem:[%s974_s19 + $0x108] sm:$0xff] %v398_v59  ;;  %v401_v2 = vsub.f32 %v241_v39, %v361_v61  ;;  %v363_v3 = vand.u32 2147483647, %v323_v62  ;;  %v364_v5 = vand.u32 2147483647, %v324_v1 }
  0x76   : > { %439 = vst [vmem:[%s974_s19 + $0x110] sm:$0xff] %v399_v60  ;;  %440 = vst [vmem:[%s974_s19 + $0x118] sm:$0xff] %v400_v63  ;;  %v402_v4 = vsub.f32 %v242_v45, %v362_v0 }
  0x77   : > { %441 = vst [vmem:[%s974_s19 + $0x120] sm:$0xff] %v401_v2  ;;  %v403_v6 = vsub.f32 %v243_v51, %v363_v3  ;;  %v404_v7 = vsub.f32 %v244_v57, %v364_v5 }
  0x78   : > { %442 = vst [vmem:[%s974_s19 + $0x128] sm:$0xff] %v402_v4 }
  0x79   : > { %443 = vst [vmem:[%s974_s19 + $0x130] sm:$0xff] %v403_v6  ;;  %444 = vst [vmem:[%s974_s19 + $0x138] sm:$0xff] %v404_v7 }
  0x7a   : > { %698 = shalt.err (!%p695_p11)
}
  0x7b   : > { %s699_s6 = scalar_lea.hbm %s1082_s16, 5120  ;;  %s703_s3 = scalar_lea.hbm %s1130_s2, 10240 }
  0x7c   : > { %p700_p3 = scmp.ne.s32.totalorder %s1082_s16, %s699_s6  ;;  %p704_p2 = scmp.lt.u32.totalorder %s1082_s16, %s1130_s2 }
  0x7d   : > { %p705_p4 = scmp.lt.u32.totalorder %s703_s3, %s699_s6  ;;  %p707_p13 = scmp.lt.u32.totalorder %s699_s6, %s1082_s16 }
  0x7e   : > { %p701_p8 = pnand %p700_p3, %p1139_p1 }
  0x7f   : > { %p706_p6 = por %p705_p4, %p704_p2 }
  0x80   : > { %p702_p0 = pneg %p701_p8 }
  0x81   : > { %p708_p12 = por %p707_p13, %p706_p6 }
  0x83   : > { %p709_p10 = pnand %p708_p12, %p702_p0 }
  0x85   : > { %712 = shalt.err (!%p709_p10)
}
  0x86   : > { %s762_s22 = smov 128   ;;  %s763_s29 = smov 8  }
  0x87   : > { %574 = dma.vmem_to_hbm [thread:$0]  (%p1139_p1), %s1076_s5, 5120, %s1082_s16, %s446_s27, %s762_s22, %s762_s22, %s763_s29  }
  0x88 PF: > { %s474_s19 = sand.u32 1, %s743_s9   ;;  %p1140_p5 = scmp.ne.s32.totalorder %s1135_s21, 0 }
  0x89   : > { %p1141_p7 = scmp.ge.s32.totalorder %s755_s12, 2  ;;  %s475_s4 = scalar_lea.sflag [#allocation4], %s474_s19 }
  0x8b   : > { %p584_p9 = pnand %p1141_p7, %p1140_p5 }
  0x8d   : > { %738 = dma.done.wait (!%p584_p9), %s475_s4, 5120  }
  0x8e   : > { %740 = vsyncadd (!%p584_p9), %s475_s4, 4294962176  ;;  %p18_p11 = scmp.ge.s32.totalorder %s804_s15, 4   ;;  %s1142_s9 = smov %s747_s10 }
  0x8f   : > { %s1143_s10 = smov %s751_s11  ;;  %s1144_s11 = smov %s816_s18 }
  0x90   : > { %s1145_s12 = smov %s804_s15  ;;  %20 = sbr.rel (!%p18_p11) target bundleno = 7 (0x7), region = 86 }
  0x97   :  { %480 = vsyncpa [#allocation3], 1 }
  0x98   :  { %482 = vsyncpa [#allocation3 + $0x1], 1 }
  0x99   :  { %483 = vsyncpa [#allocation6], 1 }
  0x9a   :  { %485 = vsyncpa [#allocation6 + $0x1], 1 }
  0x9b   :  { %486 = vsyncpa [#allocation4], 1 }
  0x9c   :  { %488 = vsyncpa [#allocation4 + $0x1], 1 }

</bundles_post_ra>
